<compile_context>
chip_gen: v5e
topology: v5e:2x2
jax: 0.10.0
libtpu: 0.0.40
codegen_flags: <defaults>
</compile_context>

<pallas_src>
import math
import jax
import jax.numpy as jnp
from jax.experimental import pallas as pl
from jax.experimental.pallas import tpu as pltpu

# Problem sizes (small, deterministic)
B = 4        # number of graphs batched into one pallas_call
N = 8        # number of nodes per graph
D_IN = 16    # input feature size
H = 4        # number of heads
D_OUT = 8    # output feature size per head
HD = H * D_OUT
NEG_SLOPE = 0.2


def gat_kernel(x_ref, w_ref, apack_ref, hmask_ref, adj_ref, out_ref, alpha_ref):
    # Per-grid-step refs (batch dim squeezed away by BlockSpec):
    #   x_ref:     (N, D_IN)
    #   w_ref:     (D_IN, H*D_OUT)
    #   apack_ref: (H*D_OUT, 2H)  block-diag [attn_l | attn_r]
    #   hmask_ref: (H*N, H*D_OUT) block-diagonal head mask
    #   adj_ref:   (N, N)         dense adjacency, adj[i, j] = 1 iff edge j -> i
    #   out_ref:   (N, H*D_OUT)
    #   alpha_ref: (N, H*N)       alpha[i, h*N + j] = a[h, i, j]

    # MXU 1: feature projection.
    feat = jnp.dot(x_ref[...], w_ref[...],
                   preferred_element_type=jnp.float32)          # (N, HD)

    # MXU 2: all heads' el/er scores in one matmul (no XLU reductions).
    scores = jnp.dot(feat, apack_ref[...],
                     preferred_element_type=jnp.float32)        # (N, 2H)
    el = scores[:, :H]                                          # (N, H) source scores
    er = scores[:, H:2 * H]                                     # (N, H) destination scores

    # e3[i, h, j] = LeakyReLU(el[j, h] + er[i, h])
    el_t = jnp.transpose(el)                                    # (H, N) tiny transpose
    z = er[:, :, None] + el_t[None, :, :]                       # (N, H, N)
    e3 = jnp.maximum(z, NEG_SLOPE * z)                          # LeakyReLU (slope < 1)

    # Masked edge-softmax over incoming edges j (per destination i and head h).
    mask3 = jnp.broadcast_to((adj_ref[...] > 0.0)[:, None, :], (N, H, N))
    e3 = jnp.where(mask3, e3, jnp.float32(-1e30))
    m = jnp.max(e3, axis=-1, keepdims=True)
    p = jnp.exp(e3 - m)                     # masked entries underflow to exactly 0
    s = jnp.sum(p, axis=-1, keepdims=True)  # > 0 because of guaranteed self-loops
    inv = pl.reciprocal(s, approx=True)     # EUP reciprocal (free slot)
    inv = inv * (2.0 - s * inv)             # one Newton step -> ~f32 accuracy
    a3 = p * inv                            # (N, H, N)

    # Lane-dense alpha store: a single (N, H*N) write.
    a_flat = a3.reshape(N, H * N)
    alpha_ref[...] = a_flat

    # MXU 3: aggregation for all heads in one matmul against block-diagonal feat.
    # feat_blk[h*N + j, h'*D + d] = feat[j, h*D + d] if h == h' else 0
    feat_blk = jnp.concatenate([feat] * H, axis=0) * hmask_ref[...]   # (H*N, HD)
    out_ref[...] = jnp.dot(a_flat, feat_blk,
                           preferred_element_type=jnp.float32)        # (N, HD)


def gat_conv(x, w, attn_l, attn_r, adj):
    """Batched GATConv forward.

    x: (B, N, D_IN), w: (D_IN, H*D_OUT), attn_l/attn_r: (H, D_OUT), adj: (B, N, N).
    Returns rst (B, N, H, D_OUT) and [alpha (B, H, N, N)] (per-head edge softmax).
    """
    bsz = x.shape[0]
    eye_h = jnp.eye(H, dtype=jnp.float32)

    # Pre-pack attention vectors into a block-diagonal (HD, 2H) matrix so el/er
    # come from a single MXU matmul inside the kernel.
    a_l = (attn_l[:, :, None] * eye_h[:, None, :]).reshape(HD, H)   # [h*D+d, h'] = al[h,d]*δ
    a_r = (attn_r[:, :, None] * eye_h[:, None, :]).reshape(HD, H)
    a_pack = jnp.concatenate([a_l, a_r], axis=1)                    # (HD, 2H)

    # Block-diagonal head mask used to fuse the per-head aggregation matmuls.
    hmask = jnp.broadcast_to(eye_h[:, None, :, None],
                             (H, N, H, D_OUT)).reshape(H * N, HD)   # (H*N, HD)

    out, alpha_flat = pl.pallas_call(
        gat_kernel,
        out_shape=(
            jax.ShapeDtypeStruct((bsz, N, HD), jnp.float32),
            jax.ShapeDtypeStruct((bsz, N, H * N), jnp.float32),
        ),
        grid=(bsz,),
        in_specs=[
            pl.BlockSpec((None, N, D_IN), lambda b: (b, 0, 0)),     # x (per graph)
            pl.BlockSpec((D_IN, HD), lambda b: (0, 0)),             # w (shared)
            pl.BlockSpec((HD, 2 * H), lambda b: (0, 0)),            # a_pack (shared)
            pl.BlockSpec((H * N, HD), lambda b: (0, 0)),            # hmask (shared)
            pl.BlockSpec((None, N, N), lambda b: (b, 0, 0)),        # adj (per graph)
        ],
        out_specs=(
            pl.BlockSpec((None, N, HD), lambda b: (b, 0, 0)),
            pl.BlockSpec((None, N, H * N), lambda b: (b, 0, 0)),
        ),
        compiler_params=pltpu.CompilerParams(
            dimension_semantics=("parallel",)),   # shards across TCs on v7x; no-op on v5e/v6e
    )(x, w, a_pack, hmask, adj)

    rst = out.reshape(bsz, N, H, D_OUT)
    # Wrapper-side layout plumbing: (B, N_dst, H*N_src) -> (B, H, N_dst, N_src).
    alpha = alpha_flat.reshape(bsz, N, H, N).transpose(0, 2, 1, 3)
    return rst, [alpha]


def reference(x, w, attn_l, attn_r, adj):
    """Pure-JAX single-graph reference matching GATConv.forward (eval mode)."""
    feat = (x @ w).reshape(N, H, D_OUT)
    el = jnp.einsum('nhd,hd->nh', feat, attn_l)   # source scores
    er = jnp.einsum('nhd,hd->nh', feat, attn_r)   # destination scores
    # e[h, i, j] = leaky_relu(el[j, h] + er[i, h])
    e = er.T[:, :, None] + el.T[:, None, :]
    e = jnp.where(e >= 0, e, NEG_SLOPE * e)
    mask = (adj > 0)[None, :, :]
    e = jnp.where(mask, e, -1e30)
    p = jnp.exp(e - jnp.max(e, axis=-1, keepdims=True)) * mask.astype(jnp.float32)
    a = p / jnp.sum(p, axis=-1, keepdims=True)
    rst = jnp.einsum('hij,jhd->ihd', a, feat)
    return rst, a


if __name__ == "__main__":
    key = jax.random.PRNGKey(0)
    kx, kw, kl, kr, ka = jax.random.split(key, 5)

    # Deterministic xavier-normal-style init (gain for 'relu' = sqrt(2)).
    gain = math.sqrt(2.0)
    w = gain * math.sqrt(2.0 / (D_IN + HD)) * jax.random.normal(
        kw, (D_IN, HD), dtype=jnp.float32)
    attn_l = gain * math.sqrt(2.0 / (HD + D_OUT)) * jax.random.normal(
        kl, (H, D_OUT), dtype=jnp.float32)
    attn_r = gain * math.sqrt(2.0 / (HD + D_OUT)) * jax.random.normal(
        kr, (H, D_OUT), dtype=jnp.float32)

    # Batch of node-feature matrices and deterministic random graphs with self loops.
    x = jax.random.normal(kx, (B, N, D_IN), dtype=jnp.float32)
    adj = jax.random.bernoulli(ka, p=0.4, shape=(B, N, N)).astype(jnp.float32)
    adj = jnp.maximum(adj, jnp.eye(N, dtype=jnp.float32)[None, :, :])  # self loops

    rst, elist = gat_conv(x, w, attn_l, attn_r, adj)
    rst = jax.block_until_ready(rst)
    alpha = jax.block_until_ready(elist[0])

    assert rst.shape == (B, N, H, D_OUT)
    assert alpha.shape == (B, H, N, N)
    for b in range(B):
        rst_ref, alpha_ref = reference(x[b], w, attn_l, attn_r, adj[b])
        assert jnp.allclose(rst[b], rst_ref, atol=2e-3, rtol=2e-3)
        assert jnp.allclose(alpha[b], alpha_ref, atol=2e-4, rtol=2e-4)

    print("KERNEL_OK")
</pallas_src>

<mosaic_0001>
module attributes {stable_mosaic.version = 11 : i64} {
  func.func @gat_kernel(%arg0: i32, %arg1: memref<1x8x16xf32, #tpu.memory_space<vmem>>, %arg2: memref<16x32xf32, #tpu.memory_space<vmem>>, %arg3: memref<32x8xf32, #tpu.memory_space<vmem>>, %arg4: memref<32x32xf32, #tpu.memory_space<vmem>>, %arg5: memref<1x8x8xf32, #tpu.memory_space<vmem>>, %arg6: memref<1x8x32xf32, #tpu.memory_space<vmem>>, %arg7: memref<1x8x32xf32, #tpu.memory_space<vmem>>) attributes {dimension_semantics = [#tpu.dimension_semantics<parallel>], iteration_bounds = array<i64: 4>, scalar_prefetch = 0 : i64, scratch_operands = 0 : i64, tpu.core_type = #tpu.core_type<tc>, window_params = [{transform_indices = @transform_0, window_bounds = array<i64: 1, 8, 16>}, {pipeline_mode = #tpu.pipeline_mode<synchronous>, transform_indices = @transform_1, window_bounds = array<i64: 16, 32>}, {pipeline_mode = #tpu.pipeline_mode<synchronous>, transform_indices = @transform_2, window_bounds = array<i64: 32, 8>}, {pipeline_mode = #tpu.pipeline_mode<synchronous>, transform_indices = @transform_3, window_bounds = array<i64: 32, 32>}, {transform_indices = @transform_4, window_bounds = array<i64: 1, 8, 8>}, {transform_indices = @transform_5, window_bounds = array<i64: 1, 8, 32>}, {transform_indices = @transform_6, window_bounds = array<i64: 1, 8, 32>}]} {
    %c0 = arith.constant 0 : index
    %c0_0 = arith.constant 0 : index
    %c0_1 = arith.constant 0 : index
    %0 = vector.load %arg1[%c0, %c0_0, %c0_1] : memref<1x8x16xf32, #tpu.memory_space<vmem>>, vector<1x8x16xf32>
    %1 = vector.shape_cast %0 : vector<1x8x16xf32> to vector<8x16xf32>
    %c0_2 = arith.constant 0 : index
    %c0_3 = arith.constant 0 : index
    %2 = vector.load %arg2[%c0_2, %c0_3] : memref<16x32xf32, #tpu.memory_space<vmem>>, vector<16x32xf32>
    %cst = arith.constant dense<0.000000e+00> : vector<8x32xf32>
    %3 = tpu.matmul %1, %2, %cst {dimension_numbers = #tpu.dot_dimension_numbers<[1], [0], [0], [1], [0, 0, 1, 1], [], []>} : vector<8x16xf32>, vector<16x32xf32>, vector<8x32xf32> -> vector<8x32xf32>
    %c0_4 = arith.constant 0 : index
    %c0_5 = arith.constant 0 : index
    %4 = vector.load %arg3[%c0_4, %c0_5] : memref<32x8xf32, #tpu.memory_space<vmem>>, vector<32x8xf32>
    %cst_6 = arith.constant dense<0.000000e+00> : vector<8x8xf32>
    %5 = tpu.matmul %3, %4, %cst_6 {dimension_numbers = #tpu.dot_dimension_numbers<[1], [0], [0], [1], [0, 0, 1, 1], [], []>} : vector<8x32xf32>, vector<32x8xf32>, vector<8x8xf32> -> vector<8x8xf32>
    %6 = vector.extract_strided_slice %5 {offsets = [0, 0], sizes = [8, 4], strides = [1, 1]} : vector<8x8xf32> to vector<8x4xf32>
    %7 = vector.extract_strided_slice %5 {offsets = [0, 4], sizes = [8, 4], strides = [1, 1]} : vector<8x8xf32> to vector<8x4xf32>
    %8 = tpu.transpose %6, [1, 0] : vector<8x4xf32> -> vector<4x8xf32>
    %9 = vector.shape_cast %7 : vector<8x4xf32> to vector<8x4x1xf32>
    %10 = vector.shape_cast %8 : vector<4x8xf32> to vector<1x4x8xf32>
    %11 = vector.broadcast %9 : vector<8x4x1xf32> to vector<8x4x8xf32>
    %12 = vector.broadcast %10 : vector<1x4x8xf32> to vector<8x4x8xf32>
    %13 = arith.addf %11, %12 : vector<8x4x8xf32>
    %cst_7 = arith.constant 2.000000e-01 : f32
    %14 = vector.broadcast %cst_7 : f32 to vector<8x4x8xf32>
    %15 = arith.mulf %14, %13 : vector<8x4x8xf32>
    %16 = arith.maximumf %13, %15 : vector<8x4x8xf32>
    %c0_8 = arith.constant 0 : index
    %c0_9 = arith.constant 0 : index
    %c0_10 = arith.constant 0 : index
    %17 = vector.load %arg5[%c0_8, %c0_9, %c0_10] : memref<1x8x8xf32, #tpu.memory_space<vmem>>, vector<1x8x8xf32>
    %18 = vector.shape_cast %17 : vector<1x8x8xf32> to vector<8x8xf32>
    %cst_11 = arith.constant 0.000000e+00 : f32
    %19 = vector.broadcast %cst_11 : f32 to vector<8x8xf32>
    %20 = arith.cmpf ogt, %18, %19 : vector<8x8xf32>
    %21 = vector.shape_cast %20 : vector<8x8xi1> to vector<8x1x8xi1>
    %22 = vector.shape_cast %21 : vector<8x1x8xi1> to vector<8x1x8xi1>
    %23 = vector.broadcast %22 : vector<8x1x8xi1> to vector<8x4x8xi1>
    %cst_12 = arith.constant -1.000000e+30 : f32
    %24 = vector.broadcast %cst_12 : f32 to vector<8x4x8xf32>
    %25 = arith.select %23, %16, %24 : vector<8x4x8xi1>, vector<8x4x8xf32>
    %cst_13 = arith.constant dense<0xFF800000> : vector<8x4xf32>
    %26 = vector.multi_reduction <maximumf>, %25, %cst_13 [2] : vector<8x4x8xf32> to vector<8x4xf32>
    %27 = vector.shape_cast %26 : vector<8x4xf32> to vector<8x4x1xf32>
    %28 = vector.broadcast %27 : vector<8x4x1xf32> to vector<8x4x8xf32>
    %29 = arith.subf %25, %28 : vector<8x4x8xf32>
    %30 = math.exp %29 : vector<8x4x8xf32>
    %cst_14 = arith.constant dense<0.000000e+00> : vector<8x4xf32>
    %31 = vector.multi_reduction <add>, %30, %cst_14 [2] : vector<8x4x8xf32> to vector<8x4xf32>
    %32 = vector.shape_cast %31 : vector<8x4xf32> to vector<8x4x1xf32>
    %33 = tpu.reciprocal %32 {approx = true} : vector<8x4x1xf32> -> vector<8x4x1xf32>
    %34 = arith.mulf %32, %33 : vector<8x4x1xf32>
    %cst_15 = arith.constant 2.000000e+00 : f32
    %35 = vector.broadcast %cst_15 : f32 to vector<8x4x1xf32>
    %36 = arith.subf %35, %34 : vector<8x4x1xf32>
    %37 = arith.mulf %33, %36 : vector<8x4x1xf32>
    %38 = vector.broadcast %37 : vector<8x4x1xf32> to vector<8x4x8xf32>
    %39 = arith.mulf %30, %38 : vector<8x4x8xf32>
    %40 = vector.shape_cast %39 : vector<8x4x8xf32> to vector<8x32xf32>
    %c0_16 = arith.constant 0 : index
    %c0_17 = arith.constant 0 : index
    %c0_18 = arith.constant 0 : index
    %41 = vector.load %arg7[%c0_16, %c0_17, %c0_18] : memref<1x8x32xf32, #tpu.memory_space<vmem>>, vector<1x8x32xf32>
    %42 = vector.shape_cast %41 : vector<1x8x32xf32> to vector<8x32xf32>
    %43 = vector.shape_cast %40 : vector<8x32xf32> to vector<1x8x32xf32>
    tpu.vector_store %arg7[%c0_16, %c0_17, %c0_18], %43 {strides = array<i32>} : memref<1x8x32xf32, #tpu.memory_space<vmem>>, vector<1x8x32xf32>,
    %44 = tpu.concatenate %3, %3, %3, %3 in 0 : vector<8x32xf32>, vector<8x32xf32>, vector<8x32xf32>, vector<8x32xf32> -> vector<32x32xf32>
    %c0_19 = arith.constant 0 : index
    %c0_20 = arith.constant 0 : index
    %45 = vector.load %arg4[%c0_19, %c0_20] : memref<32x32xf32, #tpu.memory_space<vmem>>, vector<32x32xf32>
    %46 = arith.mulf %44, %45 : vector<32x32xf32>
    %cst_21 = arith.constant dense<0.000000e+00> : vector<8x32xf32>
    %47 = tpu.matmul %40, %46, %cst_21 {dimension_numbers = #tpu.dot_dimension_numbers<[1], [0], [0], [1], [0, 0, 1, 1], [], []>} : vector<8x32xf32>, vector<32x32xf32>, vector<8x32xf32> -> vector<8x32xf32>
    %c0_22 = arith.constant 0 : index
    %c0_23 = arith.constant 0 : index
    %c0_24 = arith.constant 0 : index
    %48 = vector.load %arg6[%c0_22, %c0_23, %c0_24] : memref<1x8x32xf32, #tpu.memory_space<vmem>>, vector<1x8x32xf32>
    %49 = vector.shape_cast %48 : vector<1x8x32xf32> to vector<8x32xf32>
    %50 = vector.shape_cast %47 : vector<8x32xf32> to vector<1x8x32xf32>
    tpu.vector_store %arg6[%c0_22, %c0_23, %c0_24], %50 {strides = array<i32>} : memref<1x8x32xf32, #tpu.memory_space<vmem>>, vector<1x8x32xf32>,
    return
  }
  func.func @transform_0(%arg0: i32) -> (i32, i32, i32) {
    %c0_i32 = arith.constant 0 : i32
    %c0_i32_0 = arith.constant 0 : i32
    %c0_i32_1 = arith.constant 0 : i32
    return %arg0, %c0_i32, %c0_i32_0 : i32, i32, i32
  }
  func.func @transform_1(%arg0: i32) -> (i32, i32) {
    %c0_i32 = arith.constant 0 : i32
    %c0_i32_0 = arith.constant 0 : i32
    %c0_i32_1 = arith.constant 0 : i32
    return %c0_i32, %c0_i32_0 : i32, i32
  }
  func.func @transform_2(%arg0: i32) -> (i32, i32) {
    %c0_i32 = arith.constant 0 : i32
    %c0_i32_0 = arith.constant 0 : i32
    %c0_i32_1 = arith.constant 0 : i32
    return %c0_i32, %c0_i32_0 : i32, i32
  }
  func.func @transform_3(%arg0: i32) -> (i32, i32) {
    %c0_i32 = arith.constant 0 : i32
    %c0_i32_0 = arith.constant 0 : i32
    %c0_i32_1 = arith.constant 0 : i32
    return %c0_i32, %c0_i32_0 : i32, i32
  }
  func.func @transform_4(%arg0: i32) -> (i32, i32, i32) {
    %c0_i32 = arith.constant 0 : i32
    %c0_i32_0 = arith.constant 0 : i32
    %c0_i32_1 = arith.constant 0 : i32
    return %arg0, %c0_i32, %c0_i32_0 : i32, i32, i32
  }
  func.func @transform_5(%arg0: i32) -> (i32, i32, i32) {
    %c0_i32 = arith.constant 0 : i32
    %c0_i32_0 = arith.constant 0 : i32
    %c0_i32_1 = arith.constant 0 : i32
    return %arg0, %c0_i32, %c0_i32_0 : i32, i32, i32
  }
  func.func @transform_6(%arg0: i32) -> (i32, i32, i32) {
    %c0_i32 = arith.constant 0 : i32
    %c0_i32_0 = arith.constant 0 : i32
    %c0_i32_1 = arith.constant 0 : i32
    return %arg0, %c0_i32, %c0_i32_0 : i32, i32, i32
  }
}

</mosaic_0001>

<bundles_post_ra>
// kernel: tpu_custom_call.1
= control target key start
LH: loop header
LB: loop body
LE: loop exit
PB: predicated region body
PF: predicated region fallthrough
CT: control target
= control target key end

     0   :  { %s1582_s0 = inlined_call_operand.vmem [shape: f32[4,8,16], index: 0, kind: input, shape index: {}]   ;;  %s1583_s1 = inlined_call_operand.hbm [shape: f32[16,32], index: 1, kind: input, shape index: {}]   ;;  %s1584_s2 = inlined_call_operand.vmem [shape: f32[32,8], index: 2, kind: input, shape index: {}]   ;;  %s1585_s3 = inlined_call_operand.hbm [shape: f32[32,32], index: 3, kind: input, shape index: {}]   ;;  %s1586_s4 = inlined_call_operand.hbm [shape: f32[4,8,8], index: 4, kind: input, shape index: {}]   ;;  %s1587_s5 = inlined_call_operand.hbm [shape: f32[4,8,32], index: 5, kind: output, shape index: {0}]   ;;  %s1588_s6 = inlined_call_operand.hbm [shape: f32[4,8,32], index: 6, kind: output, shape index: {1}]  }
   0x1   :  { %1589 = sst [smem:[#allocation16_spill]] %s1583_s1 }
   0x2   :  { %12 = vsyncpa [#allocation3], 0 }
   0x3   :  { %13 = vsyncpa [#allocation6], 0 }
   0x4   :  { %14 = vsyncpa [#allocation4], 0 }
   0x5   :  { %16 = vsyncpa [#allocation4 + $0x1], 0 }
   0x6   :  { %17 = vsyncpa [#allocation10], 0 }
   0x7   :  { %19 = vsyncpa [#allocation10 + $0x1], 0  ;;  %s1314_s21 = smov 0   ;;  %s1316_s22 = smov 0  }
   0x8   :  { %s1318_s23 = smov 0   ;;  %s1320_s24 = smov 0  }
   0x9 LB: > { %s1590_s1 = sld [smem:[#allocation16_spill]]  ;;  %s1338_s28 = sadd.s32 4294967295, %s1267_s24   ;;  %s1267_s24 = sphi %s1320_s24, %s1600_s24   ;;  %s1263_s23 = sphi %s1318_s23, %s1599_s23   ;;  %s1259_s22 = sphi %s1316_s22, %s1598_s22   ;;  %s1255_s21 = sphi %s1314_s21, %s1597_s21  }
   0xa   : > { %p933_p0 = scmp.ge.s32.totalorder %s1267_s24, 1  ;;  %p135_p1 = scmp.eq.s32.totalorder %s1338_s28, 0 }
   0xb   : > { %p158_p2 = scmp.eq.s32.totalorder %s1338_s28, 3  ;;  %p197_p3 = scmp.lt.s32.totalorder %s1267_s24, 5 }
   0xc   : > { %s1269_s30 = smov [#allocation2]   ;;  %s225_s10 = sshll.u32 %s1585_s3, 4  ;;  %s226_s10 = int_to_ptr.hbm [resolvable:$true] %s225_s10 }
   0xd   : > { %p1344_p4 = pnand %p933_p0, %p197_p3  ;;  %s210_s7 = sshll.u32 %s1269_s30, 4  ;;  %s211_s7 = int_to_ptr.vmem [resolvable:$true] %s210_s7 }
   0xe   : > { %s1270_s11 = smov [#allocation5]   ;;  %s1271_s13 = smov 128  }
   0xf   : > { %s208_s27 = sshll.u32 %s1590_s1, 4  ;;  %p969_p5 = pneg %p1344_p4  ;;  %s209_s27 = int_to_ptr.hbm [resolvable:$true] %s208_s27 }
  0x10   : > { %s227_s12 = sshll.u32 %s1270_s11, 4  ;;  %s1272_s14 = smov 8   ;;  %s228_s12 = int_to_ptr.vmem [resolvable:$true] %s227_s12 }
  0x11   : > { %p970_p6 = pnand %p969_p5, %p135_p1  ;;  %s932_s15 = sadd.s32 4294967294, %s1267_s24  }
  0x12   : > { %s1357_s16 = sadd.s32 1, %s1267_s24   ;;  %s121_s17 = sadd.s32 1, %s1263_s23 }
  0x13   : > { %972 = dma.hbm_to_vmem [thread:$0]  (!%p970_p6), %s209_s27, 256, %s211_s7, [#allocation3], %s1271_s13, %s1271_s13, %s1272_s14  }
  0x14   : > { %975 = dma.hbm_to_vmem [thread:$0]  (!%p970_p6), %s226_s10, 512, %s228_s12, [#allocation6], %s1271_s13, %s1271_s13, %s1272_s14  }
  0x15   : > { %s118_s18 = ssub.s32 %s1267_s24, %s1357_s16  ;;  %p128_p7 = scmp.ne.s32.totalorder %s1263_s23, %s1259_s22 }
  0x16   : > { %p119_p8 = scmp.eq.s32.totalorder %s118_s18, 0  ;;  %p129_p9 = scmp.eq.s32.totalorder %s1267_s24, 0 }
  0x17   : > { %p134_p10 = scmp.ne.s32.totalorder %s1259_s22, %s1255_s21  ;;  %p1369_p11 = por %p158_p2, %p128_p7 }
  0x18   : > { %s1374_s20 = scalar_select %p119_p8, %s1263_s23, %s121_s17  }
  0x19   : > { %p1378_p12 = por %p135_p1, %p134_p10  ;;  %p1382_p13 = por %p129_p9, %p128_p7 }
  0x1a   : > { %p164_p0 = scmp.eq.s32.totalorder %s932_s15, 3  ;;  %p989_p3 = scmp.lt.s32.totalorder %s1267_s24, 4 }
  0x1b   : > { %s250_s27 = sand.u32 1, %s1263_s23   ;;  %s248_s7 = sand.u32 1, %s1267_s24  }
  0x1c   : > { %p1388_p5 = por %p164_p0, %p134_p10  ;;  %s937_s8 = sshll.u32 %s250_s27, 3 }
  0x1d   : > { %s938_s9 = sshll.u32 %s1267_s24, 3  ;;  %s252_s14 = scalar_lea.vmem [#allocation7], %s937_s8 }
  0x1e   : > { %s256_s12 = scalar_lea.hbm %s1586_s4, %s938_s9  ;;  %s260_s17 = sshll.u32 %s252_s14, 4  ;;  %s261_s17 = int_to_ptr.vmem [resolvable:$true] %s260_s17 }
  0x1f   : > { %s258_s13 = sshll.u32 %s256_s12, 4  ;;  %p1399_p2 = pnand %p989_p3, %p1382_p13  ;;  %s259_s13 = int_to_ptr.hbm [resolvable:$true] %s258_s13 }
  0x20   : > { %s249_s18 = scalar_lea.sflag [#allocation3], %s248_s7  ;;  %s1131_s1 = sshra.s32 %s259_s13, 4  ;;  %s1132_s1 = int_to_ptr.hbm [resolvable:$true] %s1131_s1 }
  0x21   : > { %s1133_s27 = scalar_lea.hbm %s1132_s1, 8  ;;  %p1135_p7 = pneg %p1399_p2 }
  0x22   : > { %p1134_p6 = scmp.ne.s32.totalorder %s1132_s1, %s1133_s27  ;;  %s1138_s10 = scalar_lea.hbm %s1586_s4, 32 }
  0x23   : > { %p1139_p10 = scmp.lt.s32.totalorder %s1132_s1, %s1586_s4  ;;  %p1140_p13 = scmp.lt.s32.totalorder %s1138_s10, %s1133_s27 }
  0x24   : > { %p1136_p8 = pnand %p1135_p7, %p1134_p6 }
  0x25   : > { %p1141_p0 = por %p1140_p13, %p1139_p10 }
  0x26   : > { %p1137_p9 = pneg %p1136_p8 }
  0x28   : > { %p1142_p3 = pnand %p1141_p0, %p1137_p9 }
  0x2a   : > { %1145 = shalt.err (!%p1142_p3)
}
  0x2b   : > { %979 = dma.hbm_to_vmem [thread:$0]  (!%p1399_p2), %s259_s13, 128, %s261_s17, %s249_s18  }
  0x2c   : > { %269 = sbr.rel (%p1344_p4) target bundleno = 1078 (0x436), region = 40 }
  0x31   : > { %1234 = dma.done.wait (%p135_p1), [#allocation3], 256  }
  0x32   : > { %1236 = vsyncadd (%p135_p1), [#allocation3], 4294967040 }
  0x33   : > { %1238 = dma.done.wait (%p135_p1), [#allocation6], 512  }
  0x34   : > { %1240 = vsyncadd (%p135_p1), [#allocation6], 4294966784  ;;  %s281_s1 = sand.u32 1, %s1338_s28   ;;  %s1425_s7 = sand.u32 1, %s1259_s22  }
  0x35   : > { %s1428_s29 = sshll.u32 %s1425_s7, 3  ;;  %s282_s12 = scalar_lea.sflag [#allocation3], %s281_s1 }
  0x36   : > { %s285_s13 = scalar_lea.vmem [#allocation7], %s1428_s29 }
  0x37   : > { %1242 = dma.done.wait (%p1378_p12), %s282_s12, 128  }
  0x38   : > { %1244 = vsyncadd (%p1378_p12), %s282_s12, 4294967168  ;;  %p324_p1 = scmp.lt.s32.totalorder %s1338_s28, 3  ;;  %v330_v0 = vld [vmem:[#allocation2 + $0x8] sm:$0xff]  ;;  %v329_v1 = vld [vmem:[#allocation2] sm:$0xff]  ;;  %vm331_vm0 = vcmask 130048   ;;  %v416_v7 = vlaneseq  ;;  %vm359_vm1 = vcmask 261120  }
  0x39   : > { %349 = vmatpush.msra.mxu0 %v330_v0  ;;  %v358_v3 = vld [vmem:[%s1584_s2 + $0x18] sm:$0xff]  ;;  %v357_v4 = vld [vmem:[%s1584_s2 + $0x10] sm:$0xff]  ;;  %v356_v5 = vld [vmem:[%s1584_s2 + $0x8] sm:$0xff]  ;;  %v1273_v30 = vmov 0   ;;  %vm543_vm9 = vcmask 60416   ;;  %s323_s15 = scalar_lea.vmem [#allocation9], %s1428_s29 }
  0x3a   : > { %s325_s14 = scalar_select %p324_p1, %s1338_s28, 3  ;;  %375 = vmatpush.msra.mxu1 %v358_v3  ;;  %v355_v6 = vld [vmem:[%s1584_s2] sm:$0xff]  ;;  %v417_v8 = vshrl.u32 %v416_v7, 7  ;;  %v734_v10 = vld [vmem:[#allocation5 + $0x18] sm:$0xff]  ;;  %v732_v14 = vld [vmem:[#allocation5 + $0x8] sm:$0xff] }
  0x3b   : > { %350 = vmatpush.msra.mxu0 %v329_v1  ;;  %v733_v12 = vld [vmem:[#allocation5 + $0x10] sm:$0xff]  ;;  %v731_v16 = vld [vmem:[#allocation5] sm:$0xff]  ;;  %s951_s18 = sshll.u32 %s1338_s28, 3  ;;  %s795_s25 = sshll.u32 %s323_s15, 4  ;;  %s796_s25 = int_to_ptr.vmem [resolvable:$true] %s795_s25 }
  0x3c   : > { %s945_s17 = sshll.u32 %s325_s14, 3  ;;  %376 = vmatpush.msra.mxu1 %v357_v4  ;;  %v418_v9 = vadd.s32 4, %v417_v8  ;;  %v495_v28 = vld [vmem:[%s285_s13] sm:$0xff]  ;;  %s1276_s13 = smov 16  }
  0x3d   : > { %s327_s27 = scalar_lea.vmem %s1582_s0, %s945_s17  ;;  %vm496_vm2 = vcmp.gt.f32.partialorder %v495_v28, 0.0  ;;  %s1277_s14 = smov 8  }
  0x3e   : > { %v328_v2 = vld [vmem:[%s327_s27] sm:$0xff]  ;;  %377 = vmatpush.msra.mxu1 %v356_v5  ;;  %1038 = vset.pattern.permute.xlu2 %v418_v9  ;;  %v1457_v31 = vsel %vm496_vm2, 1, %v1273_v30  ;;  %s1278_s17 = smov 24   ;;  %s793_s8 = scalar_lea.hbm %s1588_s6, %s951_s18 }
  0x3f   : > { %946 = vmatmul.msk.f32.vlgmr.msra.gmra.mxu0 %vm331_vm0, %v328_v2  ;;  %1037 = vset.pattern.permute.xlu1 %v418_v9  ;;  %v503_v33 = vrot.slane %v1457_v31, 6  ;;  %v498_v34 = vrot.slane %v1457_v31, 1  ;;  %v500_v35 = vrot.slane %v1457_v31, 3  ;;  %v504_v38 = vrot.slane %v1457_v31, 7  ;;  %s797_s10 = sshll.u32 %s793_s8, 4  ;;  %s769_s11 = scalar_lea.sflag [#allocation10], %s1425_s7  ;;  %s798_s10 = int_to_ptr.hbm [resolvable:$true] %s797_s10 }
  0x40   : > { %378 = vmatpush.msra.mxu1 %v355_v6  ;;  %1036 = vset.pattern.permute.xlu0 %v418_v9  ;;  %v499_v39 = vrot.slane %v1457_v31, 2  ;;  %v501_v56 = vrot.slane %v1457_v31, 4  ;;  %s1175_s26 = sshra.s32 %s798_s10, 4  ;;  %s1181_s28 = scalar_lea.hbm %s1588_s6, 32  ;;  %s1176_s26 = int_to_ptr.hbm [resolvable:$true] %s1175_s26 }
  0x41   : > { %vm510_vm3 = vcmp.ne.s32.totalorder %v503_v33, 0  ;;  %vm505_vm4 = vcmp.ne.s32.totalorder %v498_v34, 0  ;;  %vm507_vm5 = vcmp.ne.s32.totalorder %v500_v35, 0  ;;  %vm511_vm6 = vcmp.ne.s32.totalorder %v504_v38, 0  ;;  %s1177_s1 = scalar_lea.hbm %s1176_s26, 8  ;;  %p1182_p6 = scmp.lt.s32.totalorder %s1176_s26, %s1588_s6 }
  0x42   : > { %v517_v40 = vsel %vm510_vm3, 1, %v1273_v30  ;;  %v512_v41 = vsel %vm505_vm4, 1, %v1273_v30  ;;  %v514_v42 = vsel %vm507_vm5, 1, %v1273_v30  ;;  %vm506_vm7 = vcmp.ne.s32.totalorder %v499_v39, 0  ;;  %p1178_p4 = scmp.ne.s32.totalorder %s1176_s26, %s1177_s1  ;;  %p1183_p7 = scmp.lt.s32.totalorder %s1181_s28, %s1177_s1 }
  0x43   : > { %v525_v45 = vperm.slane %v517_v40, 0  ;;  %v520_v46 = vperm.slane %v512_v41, 0  ;;  %v522_v47 = vperm.slane %v514_v42, 0  ;;  %v518_v53 = vsel %vm511_vm6, 1, %v1273_v30 }
  0x44   : > { %v513_v55 = vsel %vm506_vm7, 1, %v1273_v30  ;;  %v526_v0 = vperm.slane %v518_v53, 0  ;;  %vm508_vm12 = vcmp.ne.s32.totalorder %v501_v56, 0  ;;  %vm657_vm5 = vcmask 1047556   ;;  %p1179_p12 = pnand %p1178_p4, %p1369_p11  ;;  %p1184_p8 = por %p1183_p7, %p1182_p6 }
  0x45   : > { %vm533_vm8 = vcmp.eq.s32.totalorder %v525_v45, 1  ;;  %vm528_vm10 = vcmp.eq.s32.totalorder %v520_v46, 1  ;;  %vm530_vm11 = vcmp.eq.s32.totalorder %v522_v47, 1  ;;  %v521_v2 = vperm.slane %v513_v55, 0 }
  0x46   : > { %vm534_vm13 = vcmp.eq.s32.totalorder %v526_v0, 1  ;;  %vm725_vm6 = vcmask 64512   ;;  %vm728_vm7 = vcmask 195584   ;;  %p1180_p2 = pneg %p1179_p12 }
  0x47   : > { %vm529_vm14 = vcmp.eq.s32.totalorder %v521_v2, 1 }
  0x48   : > { %p1185_p9 = pnand %p1184_p8, %p1180_p2 }
  0xbc   : > { %v352_v11 = vpop.f32.mrf.mxu0 }
  0xbd   : > { %947 = vmatmul.msk.f32.vlgmr.msra.gmra.mxu1 %vm359_vm1, %v352_v11  ;;  %v738_v13 = vmul.f32 %v734_v10, %v352_v11  ;;  %v737_v15 = vmul.f32 %v733_v12, %v352_v11  ;;  %v736_v17 = vmul.f32 %v732_v14, %v352_v11  ;;  %v735_v18 = vmul.f32 %v731_v16, %v352_v11 }
  0xbe   : > { %v515_v14 = vsel %vm508_vm12, 1, %v1273_v30 }
  0xbf   : > { %754 = vmatpush.msra.mxu2 %v738_v13 }
  0xc1   : > { %755 = vmatpush.msra.mxu2 %v737_v15 }
  0xc3   : > { %756 = vmatpush.msra.mxu2 %v736_v17  ;;  %v502_v17 = vrot.slane %v1457_v31, 5 }
  0xc5   : > { %757 = vmatpush.msra.mxu2 %v735_v18  ;;  %vm509_vm15 = vcmp.ne.s32.totalorder %v502_v17, 0 }
  0xc6   : > { %v516_v28 = vsel %vm509_vm15, 1, %v1273_v30 }
 0x13a   : > { %v380_v19 = vpop.f32.mrf.mxu1 }
 0x13b   : > { %v464_v20 = vperm.slane %v380_v19, 7  ;;  %v436_v21 = vperm.slane %v380_v19, 3  ;;  %v422_v22 = vperm.slane %v380_v19, 1  ;;  %v443_v23 = vperm.slane %v380_v19, 4 }
 0x13c   : > { %v457_v24 = vperm.slane %v380_v19, 6  ;;  %v429_v25 = vperm.slane %v380_v19, 2  ;;  %v415_v26 = vperm.slane %v380_v19, 0  ;;  %v450_v27 = vperm.slane %v380_v19, 5 }
 0x13d   : > { %469 = vperm.xlu2 %1038, %v464_v20   ;;  %441 = vperm.xlu0 %1036, %v436_v21   ;;  %v519_v20 = vperm.slane %v1457_v31, 0  ;;  %v523_v21 = vperm.slane %v515_v14, 0  ;;  %v524_v31 = vperm.slane %v516_v28, 0 }
 0x13e   : > { %427 = vperm.xlu1 %1037, %v422_v22  }
 0x13f   : > { %vm527_vm2 = vcmp.eq.s32.totalorder %v519_v20, 1  ;;  %vm531_vm3 = vcmp.eq.s32.totalorder %v523_v21, 1  ;;  %vm532_vm4 = vcmp.eq.s32.totalorder %v524_v31, 1 }
 0x145   : > { %448 = vperm.xlu2 %1038, %v443_v23   ;;  %462 = vperm.xlu0 %1036, %v457_v24  }
 0x146   : > { %434 = vperm.xlu1 %1037, %v429_v25  }
 0x14d   : > { %420 = vperm.xlu0 %1036, %v415_v26  }
 0x14e   : > { %455 = vperm.xlu1 %1037, %v450_v27  }
 0x16b   : > { %383 = vxpose.xlu2.b32.start.end [1/1] (short) (narrow) %v380_v19, 8 }
 0x197   : > { %v470_v29 = vpop.permute.xlu2 %469 }
 0x19f   : > { %v449_v37 = vpop.permute.xlu2 %448 }
 0x1af   : > { %v442_v32 = vpop.permute.xlu0 %441 }
 0x1b0   : > { %v428_v36 = vpop.permute.xlu1 %427 }
 0x1b7   : > { %v463_v43 = vpop.permute.xlu0 %462 }
 0x1b8   : > { %v435_v48 = vpop.permute.xlu1 %434 }
 0x1bf   : > { %v421_v6 = vpop.permute.xlu0 %420 }
 0x1c0   : > { %v456_v23 = vpop.permute.xlu1 %455 }
 0x204   : > { %v399_v44 = vpop.trf.xlu2 }
 0x205   : > { %v477_v49 = vadd.f32 %v463_v43, %v399_v44  ;;  %v472_v50 = vadd.f32 %v428_v36, %v399_v44  ;;  %v474_v51 = vadd.f32 %v442_v32, %v399_v44  ;;  %v478_v52 = vadd.f32 %v470_v29, %v399_v44 }
 0x206   : > { %v473_v54 = vadd.f32 %v435_v48, %v399_v44  ;;  %v471_v11 = vadd.f32 %v421_v6, %v399_v44  ;;  %v475_v13 = vadd.f32 %v449_v37, %v399_v44  ;;  %v476_v27 = vadd.f32 %v456_v23, %v399_v44 }
 0x207   : > { %v485_v57 = vmul.f32 0.2, %v477_v49  ;;  %v480_v58 = vmul.f32 0.2, %v472_v50  ;;  %v482_v59 = vmul.f32 0.2, %v474_v51 }
 0x208   : > { %v486_v63 = vmul.f32 0.2, %v478_v52  ;;  %v481_v1 = vmul.f32 0.2, %v473_v54  ;;  %v479_v16 = vmul.f32 0.2, %v471_v11 }
 0x209   : > { %v493_v60 = vmax.f32 %v477_v49, %v485_v57  ;;  %v488_v61 = vmax.f32 %v472_v50, %v480_v58  ;;  %v490_v62 = vmax.f32 %v474_v51, %v482_v59  ;;  %v483_v19 = vmul.f32 0.2, %v475_v13 }
 0x20a   : > { %v494_v10 = vmax.f32 %v478_v52, %v486_v63  ;;  %v489_v12 = vmax.f32 %v473_v54, %v481_v1  ;;  %v487_v25 = vmax.f32 %v471_v11, %v479_v16  ;;  %v484_v33 = vmul.f32 0.2, %v476_v27 }
 0x20b   : > { %v541_v3 = vsel %vm533_vm8, %v493_v60, -1e+30  ;;  %v536_v4 = vsel %vm528_vm10, %v488_v61, -1e+30  ;;  %v538_v5 = vsel %vm530_vm11, %v490_v62, -1e+30  ;;  %v491_v26 = vmax.f32 %v475_v13, %v483_v19 }
 0x20c   : > { %v562_v7 = vsel %vm543_vm9, %v541_v3, -inf  ;;  %v547_v8 = vsel %vm543_vm9, %v536_v4, -inf  ;;  %v553_v9 = vsel %vm543_vm9, %v538_v5, -inf  ;;  %v542_v15 = vsel %vm534_vm13, %v494_v10, -1e+30 }
 0x20d   : > { %563 = vmax.xlane.f32.xlu1 %v562_v7  ;;  %548 = vmax.xlane.f32.xlu2 %v547_v8  ;;  %v537_v18 = vsel %vm529_vm14, %v489_v12, -1e+30  ;;  %v565_v22 = vsel %vm543_vm9, %v542_v15, -inf  ;;  %v535_v29 = vsel %vm527_vm2, %v487_v25, -1e+30  ;;  %v492_v36 = vmax.f32 %v476_v27, %v484_v33 }
 0x20e   : > { %554 = vmax.xlane.f32.xlu0 %v553_v9  ;;  %v550_v24 = vsel %vm543_vm9, %v537_v18, -inf  ;;  %v539_v32 = vsel %vm531_vm3, %v491_v26, -1e+30  ;;  %v544_v34 = vsel %vm543_vm9, %v535_v29, -inf }
 0x20f   : > { %v556_v35 = vsel %vm543_vm9, %v539_v32, -inf  ;;  %v540_v37 = vsel %vm532_vm4, %v492_v36, -1e+30 }
 0x210   : > { %v559_v38 = vsel %vm543_vm9, %v540_v37, -inf }
 0x215   : > { %566 = vmax.xlane.f32.xlu1 %v565_v22 }
 0x216   : > { %551 = vmax.xlane.f32.xlu0 %v550_v24 }
 0x21d   : > { %545 = vmax.xlane.f32.xlu1 %v544_v34 }
 0x21e   : > { %557 = vmax.xlane.f32.xlu0 %v556_v35 }
 0x226   : > { %560 = vmax.xlane.f32.xlu0 %v559_v38 }
 0x280   : > { %v564_v39 = vpop.xlane.xlu1 %563  ;;  %v549_v30 = vpop.xlane.xlu2 %548 }
 0x281   : > { %v574_v40 = vsub.f32 %v541_v3, %v564_v39  ;;  %v555_v41 = vpop.xlane.xlu0 %554  ;;  %v569_v45 = vsub.f32 %v536_v4, %v549_v30 }
 0x282   : > { %v571_v42 = vsub.f32 %v538_v5, %v555_v41 }
 0x283   : > { %v588_v43 = vmul.f32 1.442695, %v574_v40  ;;  %v578_v47 = vmul.f32 1.442695, %v569_v45 }
 0x284   : > { %v582_v44 = vmul.f32 1.442695, %v571_v42 }
 0x285   : > { %1039 = vpow2.f32 %v588_v43 }
 0x286   : > { %1041 = vpow2.f32 %v582_v44 }
 0x287   : > { %1043 = vpow2.f32 %v578_v47  ;;  %v1274_v47 = vmov 1983009808  }
 0x288   : > { %v567_v46 = vpop.xlane.xlu1 %566 }
 0x289   : > { %v552_v48 = vpop.xlane.xlu0 %551  ;;  %v575_v53 = vsub.f32 %v542_v15, %v567_v46 }
 0x28a   : > { %v570_v49 = vsub.f32 %v537_v18, %v552_v48  ;;  %v660_v48 = vunpack.c.l.s4 %v1274_v47 }
 0x28b   : > { %v1482_v50 = vpop.eup %1039  ;;  %v590_v56 = vmul.f32 1.442695, %v575_v53 }
 0x28c   : > { %v580_v51 = vmul.f32 1.442695, %v570_v49  ;;  %v1484_v52 = vpop.eup %1041  ;;  %v610_v54 = vsel %vm543_vm9, %v1482_v50, 0.0 }
 0x28d   : > { %611 = vadd.xlane.f32.xlu0 %v610_v54  ;;  %v601_v55 = vsel %vm543_vm9, %v1484_v52, 0.0  ;;  %v1490_v60 = vpop.eup %1043 }
 0x28e   : > { %1045 = vpow2.f32 %v580_v51  ;;  %602 = vadd.xlane.f32.xlu1 %v601_v55  ;;  %v595_v1 = vsel %vm543_vm9, %v1490_v60, 0.0 }
 0x28f   : > { %1047 = vpow2.f32 %v590_v56 }
 0x290   : > { %v546_v58 = vpop.xlane.xlu1 %545 }
 0x291   : > { %v558_v57 = vpop.xlane.xlu0 %557  ;;  %v568_v63 = vsub.f32 %v535_v29, %v546_v58 }
 0x292   : > { %v572_v59 = vsub.f32 %v539_v32, %v558_v57 }
 0x293   : > { %v576_v2 = vmul.f32 1.442695, %v568_v63 }
 0x294   : > { %v1492_v61 = vpop.eup %1045  ;;  %v584_v62 = vmul.f32 1.442695, %v572_v59 }
 0x295   : > { %v598_v0 = vsel %vm543_vm9, %v1492_v61, 0.0  ;;  %v1498_v5 = vpop.eup %1047 }
 0x296   : > { %1049 = vpow2.f32 %v584_v62  ;;  %599 = vadd.xlane.f32.xlu0 %v598_v0  ;;  %596 = vadd.xlane.f32.xlu1 %v595_v1  ;;  %v613_v9 = vsel %vm543_vm9, %v1498_v5, 0.0 }
 0x297   : > { %1051 = vpow2.f32 %v576_v2 }
 0x299   : > { %v561_v3 = vpop.xlane.xlu0 %560 }
 0x29a   : > { %v573_v4 = vsub.f32 %v540_v37, %v561_v3 }
 0x29c   : > { %v1050_v6 = vpop.eup %1049  ;;  %v586_v7 = vmul.f32 1.442695, %v573_v4 }
 0x29d   : > { %v604_v8 = vsel %vm543_vm9, %v1050_v6, 0.0  ;;  %v1503_v10 = vpop.eup %1051 }
 0x29e   : > { %1053 = vpow2.f32 %v586_v7  ;;  %605 = vadd.xlane.f32.xlu0 %v604_v8  ;;  %614 = vadd.xlane.f32.xlu1 %v613_v9  ;;  %v592_v13 = vsel %vm543_vm9, %v1503_v10, 0.0 }
 0x2a4   : > { %v1505_v11 = vpop.eup %1053 }
 0x2a5   : > { %v607_v12 = vsel %vm543_vm9, %v1505_v11, 0.0 }
 0x2a6   : > { %608 = vadd.xlane.f32.xlu0 %v607_v12  ;;  %593 = vadd.xlane.f32.xlu1 %v592_v13 }
 0x300   : > { %v612_v14 = vpop.xlane.xlu0 %611 }
 0x301   : > { %v603_v15 = vpop.xlane.xlu1 %602  ;;  %1055 = vrcp.f32 %v612_v14 }
 0x302   : > { %1057 = vrcp.f32 %v603_v15 }
 0x307   : > { %v1056_v18 = vpop.eup %1055 }
 0x308   : > { %v1058_v19 = vpop.eup %1057  ;;  %v630_v21 = vmul.f32 %v1056_v18, %v612_v14 }
 0x309   : > { %v600_v16 = vpop.xlane.xlu0 %599  ;;  %v597_v17 = vpop.xlane.xlu1 %596  ;;  %v627_v23 = vmul.f32 %v1058_v19, %v603_v15 }
 0x30a   : > { %1059 = vrcp.f32 %v597_v17  ;;  %v638_v27 = vsub.f32 2.0, %v630_v21 }
 0x30b   : > { %1061 = vrcp.f32 %v600_v16  ;;  %v635_v28 = vsub.f32 2.0, %v627_v23 }
 0x30c   : > { %v646_v34 = vmul.f32 %v1056_v18, %v638_v27 }
 0x30d   : > { %v643_v37 = vmul.f32 %v1058_v19, %v635_v28 }
 0x30e   : > { %v654_v43 = vmul.f32 %v1482_v50, %v646_v34  ;;  %v661_v50 = vunpack.c.0.s8 %v660_v48 }
 0x30f   : > { %v651_v45 = vmul.f32 %v1484_v52, %v643_v37 }
 0x310   : > { %v1060_v20 = vpop.eup %1059  ;;  %v669_v56 = vrot.slane %v654_v43, 4 }
 0x311   : > { %v606_v22 = vpop.xlane.xlu0 %605  ;;  %v615_v24 = vpop.xlane.xlu1 %614  ;;  %v625_v25 = vmul.f32 %v1060_v20, %v597_v17  ;;  %v663_v58 = vrot.slane %v651_v45, 4 }
 0x312   : > { %1063 = vrcp.f32 %v606_v22  ;;  %v1062_v26 = vpop.eup %1061 }
 0x313   : > { %1065 = vrcp.f32 %v615_v24  ;;  %v633_v32 = vsub.f32 2.0, %v625_v25  ;;  %v626_v33 = vmul.f32 %v1062_v26, %v600_v16 }
 0x315   : > { %v641_v41 = vmul.f32 %v1060_v20, %v633_v32  ;;  %v634_v30 = vsub.f32 2.0, %v626_v33 }
 0x317   : > { %v649_v53 = vmul.f32 %v1490_v60, %v641_v41  ;;  %v642_v54 = vmul.f32 %v1062_v26, %v634_v30  ;;  %v1275_v60 = vmov 1934713408  }
 0x318   : > { %v1064_v29 = vpop.eup %1063  ;;  %v686_v4 = vunpack.c.l.s4 %v1275_v60 }
 0x319   : > { %v1066_v31 = vpop.eup %1065  ;;  %v628_v35 = vmul.f32 %v1064_v29, %v606_v22  ;;  %v609_v36 = vpop.xlane.xlu0 %608  ;;  %v664_v0 = vsel %vm657_vm5, %v663_v58, %v649_v53  ;;  %v650_v1 = vmul.f32 %v1492_v61, %v642_v54 }
 0x31a   : > { %v631_v38 = vmul.f32 %v1066_v31, %v615_v24  ;;  %v594_v39 = vpop.xlane.xlu1 %593  ;;  %1067 = vrcp.f32 %v609_v36  ;;  %v668_v12 = vperm.slane %v664_v0, %v661_v50  ;;  %v687_v15 = vunpack.c.0.s8 %v686_v4 }
 0x31b   : > { %v636_v40 = vsub.f32 2.0, %v628_v35  ;;  %1069 = vrcp.f32 %v594_v39  ;;  %v656_v13 = vrot.slane %v650_v1, 4 }
 0x31c   : > { %v639_v42 = vsub.f32 2.0, %v631_v38  ;;  %v681_v19 = vrot.slane %v668_v12, 4 }
 0x31d   : > { %v644_v44 = vmul.f32 %v1064_v29, %v636_v40 }
 0x31e   : > { %v647_v46 = vmul.f32 %v1066_v31, %v639_v42 }
 0x31f   : > { %v652_v49 = vmul.f32 %v1050_v6, %v644_v44 }
 0x320   : > { %v1068_v51 = vpop.eup %1067  ;;  %v655_v62 = vmul.f32 %v1498_v5, %v647_v46 }
 0x321   : > { %v1070_v55 = vpop.eup %1069  ;;  %v629_v57 = vmul.f32 %v1068_v51, %v609_v36  ;;  %v670_v63 = vsel %vm657_vm5, %v669_v56, %v652_v49 }
 0x322   : > { %v624_v59 = vmul.f32 %v1070_v55, %v594_v39  ;;  %v674_v6 = vperm.slane %v670_v63, %v661_v50  ;;  %v675_v8 = vrot.slane %v655_v62, 4 }
 0x323   : > { %v637_v52 = vsub.f32 2.0, %v629_v57 }
 0x324   : > { %v632_v2 = vsub.f32 2.0, %v624_v59  ;;  %v695_v61 = vrot.slane %v674_v6, 4 }
 0x325   : > { %v645_v3 = vmul.f32 %v1068_v51, %v637_v52 }
 0x326   : > { %v640_v7 = vmul.f32 %v1070_v55, %v632_v2 }
 0x327   : > { %v653_v9 = vmul.f32 %v1505_v11, %v645_v3 }
 0x328   : > { %v648_v5 = vmul.f32 %v1503_v10, %v640_v7 }
 0x329   : > { %v676_v14 = vsel %vm657_vm5, %v675_v8, %v653_v9 }
 0x32a   : > { %v658_v16 = vsel %vm657_vm5, %v656_v13, %v648_v5  ;;  %v680_v17 = vperm.slane %v676_v14, %v661_v50 }
 0x32b   : > { %v662_v18 = vperm.slane %v658_v16, %v661_v50 }
 0x32c   : > { %v696_v20 = vsel %vm657_vm5, %v680_v17, %v695_v61  ;;  %v693_v21 = vrot.slane %v680_v17, 4 }
 0x32d   : > { %v683_v22 = vrot.slane %v662_v18, 4  ;;  %v704_v23 = vperm.slane %v696_v20, %v687_v15  ;;  %v682_v11 = vsel %vm657_vm5, %v681_v19, %v662_v18 }
 0x32e   : > { %v688_v24 = vperm.slane %v682_v11, %v687_v15  ;;  %v694_v25 = vsel %vm657_vm5, %v693_v21, %v674_v6 }
 0x32f   : > { %v684_v10 = vsel %vm657_vm5, %v668_v12, %v683_v22  ;;  %v709_v26 = vrot.slane %v704_v23, 4  ;;  %v700_v27 = vperm.slane %v694_v25, %v687_v15 }
 0x330   : > { %v692_v28 = vperm.slane %v684_v10, %v687_v15  ;;  %v707_v29 = vrot.slane %v688_v24, 4 }
 0x331   : > { %v705_v32 = vrot.slane %v700_v27, 4 }
 0x332   : > { %v710_v33 = vsel %vm657_vm5, %v709_v26, %v692_v28  ;;  %v708_v31 = vsel %vm657_vm5, %v700_v27, %v707_v29  ;;  %v711_v35 = vrot.slane %v692_v28, 4 }
 0x333   : > { %718 = vrot.lane.b32.xlu0 %v710_v33, %s1276_s13  ;;  %714 = vrot.lane.b32.xlu1 %v708_v31, %s1277_s14  ;;  %v706_v34 = vsel %vm657_vm5, %v705_v32, %v688_v24 }
 0x334   : > { %v712_v36 = vsel %vm657_vm5, %v704_v23, %v711_v35 }
 0x33b   : > { %722 = vrot.lane.b32.xlu1 %v712_v36, %s1278_s17 }
 0x3a5   : > { %v715_v37 = vpop.permute.xlu1 %714  ;;  %v719_v38 = vpop.permute.xlu0 %718 }
 0x3a6   : > { %v726_v39 = vsel %vm725_vm6, %v706_v34, %v715_v37 }
 0x3a7   : > { %v727_v41 = vsel %vm331_vm0, %v726_v39, %v719_v38 }
 0x3ad   : > { %v723_v40 = vpop.permute.xlu1 %722 }
 0x3ae   : > { %v729_v30 = vsel %vm728_vm7, %v727_v41, %v723_v40 }
 0x3af   : > { %948 = vmatmul.msk.f32.vlgmr.msra.gmra.mxu2 %vm359_vm1, %v729_v30  ;;  %730 = vst.msk [vmem:[%s323_s15] sm:$0xff] %vm359_vm1, %v729_v30 }
 0x3b0   : > { %1188 = shalt.err (!%p1185_p9)
}
 0x3b1   : > { %966 = dma.vmem_to_hbm [thread:$0]  (%p1369_p11), %s796_s25, 128, %s798_s10, %s769_s11  }
 0x3b2   : > { %s779_s9 = scalar_lea.hbm %s1587_s5, %s951_s18  ;;  %s316_s8 = scalar_lea.vmem [#allocation8], %s1428_s29 }
 0x3b3   : > { %s781_s12 = sshll.u32 %s316_s8, 4  ;;  %s783_s13 = sshll.u32 %s779_s9, 4  ;;  %s782_s12 = int_to_ptr.vmem [resolvable:$true] %s781_s12  ;;  %s784_s13 = int_to_ptr.hbm [resolvable:$true] %s783_s13 }
 0x3b4   : > { %s764_s26 = scalar_lea.sflag [#allocation4], %s1425_s7  ;;  %s1203_s1 = sshra.s32 %s784_s13, 4  ;;  %s1204_s1 = int_to_ptr.hbm [resolvable:$true] %s1203_s1 }
 0x3b5   : > { %s1205_s28 = scalar_lea.hbm %s1204_s1, 8  ;;  %s1209_s18 = scalar_lea.hbm %s1587_s5, 32 }
 0x3b6   : > { %p1206_p10 = scmp.ne.s32.totalorder %s1204_s1, %s1205_s28  ;;  %p1210_p3 = scmp.lt.s32.totalorder %s1204_s1, %s1587_s5 }
 0x3b7   : > { %p1211_p1 = scmp.lt.s32.totalorder %s1209_s18, %s1205_s28 }
 0x3b8   : > { %p1207_p13 = pnand %p1206_p10, %p1369_p11 }
 0x3b9   : > { %p1212_p4 = por %p1211_p1, %p1210_p3 }
 0x3ba   : > { %p1208_p0 = pneg %p1207_p13 }
 0x3bc   : > { %p1213_p12 = pnand %p1212_p4, %p1208_p0 }
 0x432   : > { %v759_v42 = vpop.f32.mrf.mxu2 }
 0x433   : > { %762 = vst.msk [vmem:[%s316_s8] sm:$0xff] %vm359_vm1, %v759_v42 }
 0x434   : > { %1216 = shalt.err (!%p1213_p12)
}
 0x435   : > { %965 = dma.vmem_to_hbm [thread:$0]  (%p1369_p11), %s782_s12, 128, %s784_s13, %s764_s26  }
 0x436 PF: > { %p992_p2 = scmp.ge.s32.totalorder %s1267_s24, 2  ;;  %s809_s7 = sand.u32 1, %s1255_s21  }
 0x437   : > { %s810_s14 = scalar_lea.sflag [#allocation4], %s809_s7 }
 0x438   : > { %p981_p6 = pnand %p992_p2, %p1388_p5 }
 0x43a   : > { %p982_p7 = pneg %p981_p6 }
 0x43c   : > { %1246 = dma.done.wait (%p982_p7), %s810_s14, 128  }
 0x43d   : > { %1248 = vsyncadd (%p982_p7), %s810_s14, 4294967168  ;;  %s820_s17 = scalar_lea.sflag [#allocation10], %s809_s7 }
 0x43e   : > { %1250 = dma.done.wait (%p982_p7), %s820_s17, 128  }
 0x43f   : > { %1252 = vsyncadd (%p982_p7), %s820_s17, 4294967168  ;;  %p22_p11 = scmp.ge.s32.totalorder %s1357_s16, 6   ;;  %s1597_s21 = smov %s1259_s22 }
 0x440   : > { %s1598_s22 = smov %s1263_s23  ;;  %s1599_s23 = smov %s1374_s20 }
 0x441   : > { %s1600_s24 = smov %s1357_s16  ;;  %24 = sbr.rel (!%p22_p11) target bundleno = 9 (0x9), region = 112 }
 0x446   :  { %826 = vsyncpa [#allocation3], 1 }
 0x447   :  { %828 = vsyncpa [#allocation3 + $0x1], 1 }
 0x448   :  { %829 = vsyncpa [#allocation6], 1 }
 0x449   :  { %830 = vsyncpa [#allocation4], 1 }
 0x44a   :  { %832 = vsyncpa [#allocation4 + $0x1], 1 }
 0x44b   :  { %833 = vsyncpa [#allocation10], 1 }
 0x44c   :  { %835 = vsyncpa [#allocation10 + $0x1], 1 }

</bundles_post_ra>
